<compile_context>
chip_gen: v7x
topology: tpu7x:2x2x1
jax: 0.10.0
libtpu: 0.0.40
codegen_flags: <defaults>
</compile_context>

<pallas_src>
import math
import functools

import jax
import jax.numpy as jnp
from jax.experimental import pallas as pl
from jax.experimental.pallas import tpu as pltpu


def _mha_kernel(q_ref, k_ref, v_ref, out_ref, attn_ref, *, scale):
    """One grid step = (one batch element, one q-tile)."""
    q = q_ref[0]          # [TQ, Dk]
    k = k_ref[0]          # [Sk, Dk]
    v = v_ref[0]          # [Sk, Dv]

    # Q @ K^T: contract last dims directly (no in-kernel .T / XLU transpose).
    s = jax.lax.dot_general(
        q, k, (((1,), (1,)), ((), ())),
        preferred_element_type=jnp.float32) * scale            # [TQ, Sk] f32

    # Numerically-stable softmax along Sk.
    m = jnp.max(s, axis=-1, keepdims=True)
    e = jnp.exp(s - m)
    denom = jnp.sum(e, axis=-1, keepdims=True)
    p = e * pl.reciprocal(denom, approx=True)                  # EUP reciprocal

    attn_ref[0] = p.astype(attn_ref.dtype)

    # attn @ V (cast probs to V's dtype so bf16 inputs use the bf16 MXU path).
    out_ref[0] = jnp.dot(p.astype(v.dtype), v,
                         preferred_element_type=jnp.float32).astype(out_ref.dtype)


def multihead_attention(key, value, query, num_hidden_k, *, tq=None,
                        vmem_limit_bytes=None):
    """key: [B,Sk,Dk], value: [B,Sk,Dv], query: [B,Sq,Dq] (Dq==Dk).
       Returns (result [B,Sq,Dv], attn [B,Sq,Sk]) matching the PyTorch module."""
    B, Sk, Dk = key.shape
    Bv, Skv, Dv = value.shape
    Bq, Sq, Dq = query.shape
    assert B == Bv == Bq and Sk == Skv and Dq == Dk

    # q-tile: full Sq if small, else 128-row (sublane-aligned) tiles.
    if tq is None:
        tq = Sq if Sq <= 128 else 128
    nq = pl.cdiv(Sq, tq)

    scale = 1.0 / math.sqrt(num_hidden_k)
    kernel = functools.partial(_mha_kernel, scale=scale)

    if vmem_limit_bytes is None:
        isz = jnp.dtype(query.dtype).itemsize
        blk = (2 * Sk * (Dk + Dv) * jnp.dtype(key.dtype).itemsize   # K,V (dbl-buffered)
               + 2 * tq * Dk * isz                                  # Q tiles
               + 2 * tq * Dv * isz + 2 * tq * Sk * 4                # out + attn tiles
               + 4 * tq * Sk * 4)                                   # score/exp temps
        vmem_limit_bytes = int(min(64 * 1024 * 1024,
                                   max(16 * 1024 * 1024, 2 * blk)))

    out, attn = pl.pallas_call(
        kernel,
        out_shape=(
            jax.ShapeDtypeStruct((B, Sq, Dv), query.dtype),
            jax.ShapeDtypeStruct((B, Sq, Sk), jnp.float32),
        ),
        grid_spec=pltpu.PrefetchScalarGridSpec(
            num_scalar_prefetch=0,
            grid=(B, nq),
            in_specs=[
                pl.BlockSpec((1, tq, Dk), lambda b, qi: (b, qi, 0)),   # query tile
                pl.BlockSpec((1, Sk, Dk), lambda b, qi: (b, 0, 0)),    # key (resident)
                pl.BlockSpec((1, Sk, Dv), lambda b, qi: (b, 0, 0)),    # value (resident)
            ],
            out_specs=[
                pl.BlockSpec((1, tq, Dv), lambda b, qi: (b, qi, 0)),   # result tile
                pl.BlockSpec((1, tq, Sk), lambda b, qi: (b, qi, 0)),   # attn tile
            ],
        ),
        compiler_params=pltpu.CompilerParams(
            dimension_semantics=("parallel", "arbitrary"),
            vmem_limit_bytes=vmem_limit_bytes,
        ),
    )(query, key, value)

    return out, attn


def _reference(key, value, query, num_hidden_k):
    """Pure-JAX replica of the PyTorch forward (mask=None, query_mask=None)."""
    attn = jnp.einsum("bqd,bkd->bqk", query, key) / math.sqrt(num_hidden_k)
    attn = jax.nn.softmax(attn, axis=-1)
    result = jnp.einsum("bqk,bkd->bqd", attn, value)
    return result, attn


if __name__ == "__main__":
    rng = jax.random.PRNGKey(0)
    B, Sq, Sk, D = 2, 8, 16, 32          # small demo shapes; num_hidden_k = D

    kk, kv, kq = jax.random.split(rng, 3)
    key_t = jax.random.normal(kk, (B, Sk, D), jnp.float32)
    value_t = jax.random.normal(kv, (B, Sk, D), jnp.float32)
    query_t = jax.random.normal(kq, (B, Sq, D), jnp.float32)

    out, attn = multihead_attention(key_t, value_t, query_t, num_hidden_k=D)
    out = jax.block_until_ready(out)
    attn = jax.block_until_ready(attn)

    ref_out, ref_attn = _reference(key_t, value_t, query_t, D)
    assert out.shape == (B, Sq, D)
    assert attn.shape == (B, Sq, Sk)
    # approx reciprocal in the softmax -> allow a slightly loosened tolerance.
    assert jnp.allclose(attn, ref_attn, atol=2e-3, rtol=2e-3)
    assert jnp.allclose(out, ref_out, atol=2e-3, rtol=2e-3)

    print("KERNEL_OK")
</pallas_src>

<mosaic_0001>
module attributes {stable_mosaic.version = 11 : i64} {
  func.func @_mha_kernel(%arg0: i32, %arg1: i32, %arg2: memref<1x8x32xf32, #tpu.memory_space<vmem>>, %arg3: memref<1x16x32xf32, #tpu.memory_space<vmem>>, %arg4: memref<1x16x32xf32, #tpu.memory_space<vmem>>, %arg5: memref<1x8x32xf32, #tpu.memory_space<vmem>>, %arg6: memref<1x8x16xf32, #tpu.memory_space<vmem>>) attributes {dimension_semantics = [#tpu.dimension_semantics<parallel>, #tpu.dimension_semantics<arbitrary>], iteration_bounds = array<i64: 2, 1>, scalar_prefetch = 0 : i64, scratch_operands = 0 : i64, tpu.core_type = #tpu.core_type<tc>, window_params = [{transform_indices = @transform_0, window_bounds = array<i64: 1, 8, 32>}, {transform_indices = @transform_1, window_bounds = array<i64: 1, 16, 32>}, {transform_indices = @transform_2, window_bounds = array<i64: 1, 16, 32>}, {transform_indices = @transform_3, window_bounds = array<i64: 1, 8, 32>}, {transform_indices = @transform_4, window_bounds = array<i64: 1, 8, 16>}]} {
    %c0 = arith.constant 0 : index
    %c0_0 = arith.constant 0 : index
    %c0_1 = arith.constant 0 : index
    %0 = vector.load %arg2[%c0, %c0_0, %c0_1] : memref<1x8x32xf32, #tpu.memory_space<vmem>>, vector<1x8x32xf32>
    %1 = vector.shape_cast %0 : vector<1x8x32xf32> to vector<8x32xf32>
    %c0_2 = arith.constant 0 : index
    %c0_3 = arith.constant 0 : index
    %c0_4 = arith.constant 0 : index
    %2 = vector.load %arg3[%c0_2, %c0_3, %c0_4] : memref<1x16x32xf32, #tpu.memory_space<vmem>>, vector<1x16x32xf32>
    %3 = vector.shape_cast %2 : vector<1x16x32xf32> to vector<16x32xf32>
    %c0_5 = arith.constant 0 : index
    %c0_6 = arith.constant 0 : index
    %c0_7 = arith.constant 0 : index
    %4 = vector.load %arg4[%c0_5, %c0_6, %c0_7] : memref<1x16x32xf32, #tpu.memory_space<vmem>>, vector<1x16x32xf32>
    %5 = vector.shape_cast %4 : vector<1x16x32xf32> to vector<16x32xf32>
    %cst = arith.constant dense<0.000000e+00> : vector<8x16xf32>
    %6 = tpu.matmul %1, %3, %cst {dimension_numbers = #tpu.dot_dimension_numbers<[1], [1], [0], [0], [0, 0, 1, 0], [], []>} : vector<8x32xf32>, vector<16x32xf32>, vector<8x16xf32> -> vector<8x16xf32>
    %cst_8 = arith.constant 0.176776692 : f32
    %7 = vector.broadcast %cst_8 : f32 to vector<8x16xf32>
    %8 = arith.mulf %6, %7 : vector<8x16xf32>
    %cst_9 = arith.constant dense<0xFF800000> : vector<8xf32>
    %9 = vector.multi_reduction <maximumf>, %8, %cst_9 [1] : vector<8x16xf32> to vector<8xf32>
    %10 = vector.shape_cast %9 : vector<8xf32> to vector<8x1xf32>
    %11 = vector.broadcast %10 : vector<8x1xf32> to vector<8x16xf32>
    %12 = arith.subf %8, %11 : vector<8x16xf32>
    %13 = math.exp %12 : vector<8x16xf32>
    %cst_10 = arith.constant dense<0.000000e+00> : vector<8xf32>
    %14 = vector.multi_reduction <add>, %13, %cst_10 [1] : vector<8x16xf32> to vector<8xf32>
    %15 = vector.shape_cast %14 : vector<8xf32> to vector<8x1xf32>
    %16 = tpu.reciprocal %15 {approx = true} : vector<8x1xf32> -> vector<8x1xf32>
    %17 = vector.broadcast %16 : vector<8x1xf32> to vector<8x16xf32>
    %18 = arith.mulf %13, %17 : vector<8x16xf32>
    %c0_11 = arith.constant 0 : index
    %c0_12 = arith.constant 0 : index
    %c0_13 = arith.constant 0 : index
    %19 = vector.load %arg6[%c0_11, %c0_12, %c0_13] : memref<1x8x16xf32, #tpu.memory_space<vmem>>, vector<1x8x16xf32>
    %20 = vector.shape_cast %19 : vector<1x8x16xf32> to vector<8x16xf32>
    %21 = vector.shape_cast %18 : vector<8x16xf32> to vector<1x8x16xf32>
    tpu.vector_store %arg6[%c0_11, %c0_12, %c0_13], %21 {strides = array<i32>} : memref<1x8x16xf32, #tpu.memory_space<vmem>>, vector<1x8x16xf32>,
    %cst_14 = arith.constant dense<0.000000e+00> : vector<8x32xf32>
    %22 = tpu.matmul %18, %5, %cst_14 {dimension_numbers = #tpu.dot_dimension_numbers<[1], [0], [0], [1], [0, 0, 1, 1], [], []>} : vector<8x16xf32>, vector<16x32xf32>, vector<8x32xf32> -> vector<8x32xf32>
    %c0_15 = arith.constant 0 : index
    %c0_16 = arith.constant 0 : index
    %c0_17 = arith.constant 0 : index
    %23 = vector.load %arg5[%c0_15, %c0_16, %c0_17] : memref<1x8x32xf32, #tpu.memory_space<vmem>>, vector<1x8x32xf32>
    %24 = vector.shape_cast %23 : vector<1x8x32xf32> to vector<8x32xf32>
    %25 = vector.shape_cast %22 : vector<8x32xf32> to vector<1x8x32xf32>
    tpu.vector_store %arg5[%c0_15, %c0_16, %c0_17], %25 {strides = array<i32>} : memref<1x8x32xf32, #tpu.memory_space<vmem>>, vector<1x8x32xf32>,
    return
  }
  func.func @transform_0(%arg0: i32, %arg1: i32) -> (i32, i32, i32) {
    %c0_i32 = arith.constant 0 : i32
    %c0_i32_0 = arith.constant 0 : i32
    return %arg0, %arg1, %c0_i32 : i32, i32, i32
  }
  func.func @transform_1(%arg0: i32, %arg1: i32) -> (i32, i32, i32) {
    %c0_i32 = arith.constant 0 : i32
    %c0_i32_0 = arith.constant 0 : i32
    %c0_i32_1 = arith.constant 0 : i32
    return %arg0, %c0_i32, %c0_i32_0 : i32, i32, i32
  }
  func.func @transform_2(%arg0: i32, %arg1: i32) -> (i32, i32, i32) {
    %c0_i32 = arith.constant 0 : i32
    %c0_i32_0 = arith.constant 0 : i32
    %c0_i32_1 = arith.constant 0 : i32
    return %arg0, %c0_i32, %c0_i32_0 : i32, i32, i32
  }
  func.func @transform_3(%arg0: i32, %arg1: i32) -> (i32, i32, i32) {
    %c0_i32 = arith.constant 0 : i32
    %c0_i32_0 = arith.constant 0 : i32
    return %arg0, %arg1, %c0_i32 : i32, i32, i32
  }
  func.func @transform_4(%arg0: i32, %arg1: i32) -> (i32, i32, i32) {
    %c0_i32 = arith.constant 0 : i32
    %c0_i32_0 = arith.constant 0 : i32
    return %arg0, %arg1, %c0_i32 : i32, i32, i32
  }
}

</mosaic_0001>

<bundles_post_ra>
// kernel: tpu_custom_call.1
= control target key start
LH: loop header
LB: loop body
LE: loop exit
PB: predicated region body
PF: predicated region fallthrough
CT: control target
= control target key end

     0   :  { %s1376_s0 = inlined_call_operand.hbm [shape: f32[2,8,32], index: 0, kind: input, shape index: {}]   ;;  %s1377_s1 = inlined_call_operand.hbm [shape: f32[2,16,32], index: 1, kind: input, shape index: {}]   ;;  %s1378_s2 = inlined_call_operand.hbm [shape: f32[2,16,32], index: 2, kind: input, shape index: {}]   ;;  %s1379_s3 = inlined_call_operand.hbm [shape: f32[2,8,32], index: 3, kind: output, shape index: {0}]   ;;  %s1380_s4 = inlined_call_operand.hbm [shape: f32[2,8,16], index: 4, kind: output, shape index: {1}]  }
   0x1   :  { %1390 = sst [smem:[#allocation19_spill]] %s1377_s1 }
   0x2   :  { %10 = vsyncpa [#allocation3], 0 }
   0x3   :  { %12 = vsyncpa [#allocation3 + $0x1], 0 }
   0x4   :  { %13 = vsyncpa [#allocation6], 0 }
   0x5   :  { %15 = vsyncpa [#allocation6 + $0x1], 0 }
   0x6   :  { %16 = vsyncpa [#allocation4], 0 }
   0x7   :  { %18 = vsyncpa [#allocation4 + $0x1], 0 }
   0x8   :  { %19 = vsyncpa [#allocation10], 0 }
   0x9   :  { %21 = vsyncpa [#allocation10 + $0x1], 0  ;;  %s1071_s15 = smov 0   ;;  %s1073_s16 = smov 0  }
   0xa   :  { %s1075_s17 = smov 0   ;;  %s1077_s18 = smov 0  }
   0xb   :  { %s1079_s19 = smov 0   ;;  %s1081_s20 = smov 0  }
   0xc LB: > { %1391 = sst [smem:[#allocation15_spill]] %s1022_s17  ;;  %s1102_s21 = sadd.s32 4294967295, %s1034_s20   ;;  %s1034_s20 = sphi %s1081_s20, %s27_s20   ;;  %s1030_s19 = sphi %s1079_s19, %s1418_s19   ;;  %s1026_s18 = sphi %s1077_s18, %s1417_s18   ;;  %s1022_s17 = sphi %s1075_s17, %s1413_s17   ;;  %s1018_s16 = sphi %s1073_s16, %s1416_s16   ;;  %s1014_s15 = sphi %s1071_s15, %s1415_s15  }
   0xd   : > { %s684_s22 = sadd.s32 4294967294, %s1034_s20   ;;  %s39_s23 = sadd.s32 1, %s1030_s19 }
   0xe   : > { %s48_s24 = sadd.s32 1, %s1022_s17  ;;  %p41_p0 = scmp.ge.s32.totalorder %s39_s23, 2 }
   0xf   : > { %p55_p1 = scmp.ne.s32.totalorder %s1022_s17, %s1018_s16  ;;  %p56_p2 = scmp.eq.s32.totalorder %s1034_s20, 0 }
  0x10   : > { %p61_p3 = scmp.ne.s32.totalorder %s1018_s16, %s1014_s15  ;;  %s1420_s23 = smov (%p41_p0, %s39_s23), 0 }
  0x11   : > { %1392 = sst [smem:[#allocation16_spill]] %s1420_s23  ;;  %p1114_p4 = por %p56_p2, %p55_p1 }
  0x12   : > { %p62_p5 = scmp.eq.s32.totalorder %s1102_s21, 0  ;;  %s43_s26 = ssub.s32 %s1030_s19, %s1420_s23 }
  0x13   : > { %p139_p6 = scmp.eq.s32.totalorder %s1102_s21, 1  ;;  %p46_p7 = scmp.eq.s32.totalorder %s43_s26, 0 }
  0x14   : > { %p1122_p8 = por %p62_p5, %p61_p3  ;;  %p145_p10 = scmp.eq.s32.totalorder %s684_s22, 1 }
  0x15   : > { %p1126_p9 = por %p139_p6, %p55_p1  ;;  %p767_p13 = scmp.lt.s32.totalorder %s1034_s20, 2 }
  0x16   : > { %s1394_s27 = scalar_select %p1122_p8, 1, 0 }
  0x17   : > { %s1395_s28 = scalar_select %p1126_p9, 1, 0 }
  0x18   : > { %s1131_s29 = scalar_select %p46_p7, %s1022_s17, %s48_s24  }
  0x19   : > { %p1133_p11 = por %p145_p10, %p61_p3  ;;  %s1140_s5 = sand.u32 1, %s1022_s17  }
  0x1a   : > { %1396 = sst [smem:[#allocation17_spill]] %s1131_s29  ;;  %s212_s6 = sand.u32 1, %s1034_s20  }
  0x1b   : > { %s1397_s30 = scalar_select %p1133_p11, 1, 0 }
  0x1c   : > { %s1381_s7 = sshll.u32 %s1140_s5, 4  ;;  %p1146_p0 = pnand %p767_p13, %p1114_p4 }
  0x1d   : > { %1398 = sst [smem:[#allocation18_spill]] %s1397_s30  ;;  %s711_s9 = sshll.u32 %s1030_s19, 8 }
  0x1e   : > { %s1399_s8 = scalar_select %p1146_p0, 1, 0 }
  0x1f   : > { %s1400_s1 = sld [smem:[#allocation19_spill]]  ;;  %s216_s13 = scalar_lea.vmem [#allocation5], %s1381_s7 }
  0x20   : > { %s223_s14 = sshll.u32 %s216_s13, 4  ;;  %s1162_s22 = scalar_lea.sflag [#allocation6], %s212_s6  ;;  %s1160_s14 = int_to_ptr.vmem [resolvable:$true] %s223_s14 }
  0x21   : > { %p1168_p2 = pneg %p1146_p0 }
  0x25   : > { %s1156_s12 = scalar_lea.hbm %s1400_s1, %s711_s9  ;;  %s831_s11 = scalar_lea.hbm %s1400_s1, 512 }
  0x26   : > { %s826_s24 = scalar_lea.hbm %s1156_s12, 256  ;;  %p832_p5 = scmp.lt.u32.totalorder %s1156_s12, %s1400_s1 }
  0x27   : > { %p827_p1 = scmp.ne.s32.totalorder %s1156_s12, %s826_s24  ;;  %p833_p6 = scmp.lt.u32.totalorder %s831_s11, %s826_s24 }
  0x28   : > { %p835_p10 = scmp.lt.u32.totalorder %s826_s24, %s1156_s12 }
  0x29   : > { %p829_p3 = pnand %p1168_p2, %p827_p1  ;;  %p834_p7 = por %p833_p6, %p832_p5 }
  0x2b   : > { %p830_p4 = pneg %p829_p3  ;;  %p836_p13 = por %p835_p10, %p834_p7 }
  0x2d   : > { %p837_p12 = pnand %p836_p13, %p830_p4 }
  0x2f   : > { %840 = shalt.err (!%p837_p12)
}
  0x30   : > { %s841_s6 = scalar_lea.vmem %s1160_s14, 256  ;;  %s1036_s26 = smov [#allocation5]  }
  0x31   : > { %p842_p1 = scmp.ne.s32.totalorder %s1160_s14, %s841_s6  ;;  %s846_s10 = sshll.u32 %s1036_s26, 4  ;;  %s847_s10 = int_to_ptr.vmem [resolvable:$false] %s846_s10 }
  0x32   : > { %s848_s7 = scalar_lea.vmem %s847_s10, 512  ;;  %p849_p9 = scmp.lt.s32.totalorder %s1160_s14, %s847_s10 }
  0x33   : > { %p844_p3 = pnand %p842_p1, %p1168_p2  ;;  %p850_p8 = scmp.lt.s32.totalorder %s848_s7, %s841_s6 }
  0x35   : > { %p845_p11 = pneg %p844_p3  ;;  %p851_p5 = por %p850_p8, %p849_p9 }
  0x37   : > { %p852_p6 = pnand %p851_p5, %p845_p11 }
  0x39   : > { %855 = shalt.err (!%p852_p6)
}
  0x3a   : > { %s1387_s24 = smov 128   ;;  %s1038_s11 = smov 8  }
  0x3b   : > { %756 = dma.hbm_to_vmem [thread:$0]  (!%p1146_p0), %s1156_s12, 256, %s1160_s14, %s1162_s22, %s1387_s24, %s1387_s24, %s1038_s11  }
  0x3c   : > { %s1200_s26 = scalar_lea.hbm %s1378_s2, %s711_s9  ;;  %p695_p8 = scmp.ge.s32.totalorder %s1034_s20, 1 }
  0x3d   : > { %s1402_s10 = sshll.u32 %s1140_s5, 4  ;;  %p252_p9 = scmp.lt.s32.totalorder %s1034_s20, 3 }
  0x3e   : > { %s237_s7 = scalar_lea.vmem [#allocation7], %s1402_s10  ;;  %s687_s29 = sshll.u32 %s1140_s5, 3 }
  0x3f   : > { %s244_s1 = sshll.u32 %s237_s7, 4  ;;  %p1206_p11 = pnand %p695_p8, %p252_p9  ;;  %s1217_s1 = int_to_ptr.vmem [resolvable:$true] %s244_s1 }
  0x40   : > { %s688_s17 = sshll.u32 %s1030_s19, 7  ;;  %s197_s9 = scalar_lea.vmem [#allocation2], %s687_s29 }
  0x41   : > { %s1403_s23 = scalar_select %p1206_p11, 1, 0 }
  0x42   : > { %s1215_s14 = scalar_lea.hbm %s1376_s0, %s688_s17  ;;  %s205_s13 = sshll.u32 %s197_s9, 4  ;;  %s206_s13 = int_to_ptr.vmem [resolvable:$true] %s205_s13 }
  0x43   : > { %s194_s6 = scalar_lea.sflag [#allocation3], %s1140_s5  ;;  %s856_s10 = scalar_lea.hbm %s1215_s14, 128 }
  0x44   : > { %p857_p12 = scmp.ne.s32.totalorder %s1215_s14, %s856_s10  ;;  %s861_s17 = scalar_lea.hbm %s1376_s0, 256 }
  0x45   : > { %p862_p10 = scmp.lt.u32.totalorder %s1215_s14, %s1376_s0  ;;  %p863_p13 = scmp.lt.u32.totalorder %s861_s17, %s856_s10 }
  0x46   : > { %p859_p4 = pnand %p857_p12, %p1168_p2  ;;  %p865_p3 = scmp.lt.u32.totalorder %s856_s10, %s1215_s14 }
  0x47   : > { %p864_p1 = por %p863_p13, %p862_p10 }
  0x48   : > { %p860_p7 = pneg %p859_p4 }
  0x49   : > { %p866_p5 = por %p865_p3, %p864_p1 }
  0x4b   : > { %p867_p6 = pnand %p866_p5, %p860_p7 }
  0x4d   : > { %870 = shalt.err (!%p867_p6)
}
  0x4e   : > { %s871_s29 = scalar_lea.vmem %s206_s13, 128  ;;  %s1039_s5 = smov [#allocation2]  }
  0x4f   : > { %p872_p8 = scmp.ne.s32.totalorder %s206_s13, %s871_s29  ;;  %s876_s9 = sshll.u32 %s1039_s5, 4  ;;  %s877_s9 = int_to_ptr.vmem [resolvable:$false] %s876_s9 }
  0x50   : > { %s878_s24 = scalar_lea.vmem %s877_s9, 256  ;;  %p879_p4 = scmp.lt.s32.totalorder %s206_s13, %s877_s9 }
  0x51   : > { %p874_p9 = pnand %p872_p8, %p1168_p2  ;;  %p880_p11 = scmp.lt.s32.totalorder %s878_s24, %s871_s29 }
  0x53   : > { %p875_p12 = pneg %p874_p9  ;;  %p881_p0 = por %p880_p11, %p879_p4 }
  0x55   : > { %p882_p10 = pnand %p881_p0, %p875_p12 }
  0x57   : > { %885 = shalt.err (!%p882_p10)
}
  0x58   : > { %p1404_p13 = scmp.ne.s32.totalorder %s1399_s8, 0  ;;  %s886_s10 = scalar_lea.hbm %s1200_s26, 256 }
  0x59   : > { %p887_p7 = scmp.ne.s32.totalorder %s1200_s26, %s886_s10  ;;  %s891_s30 = scalar_lea.hbm %s1378_s2, 512 }
  0x5a   : > { %753 = dma.hbm_to_vmem [thread:$0]  (!%p1404_p13), %s1215_s14, 128, %s206_s13, %s194_s6  }
  0x5b   : > { %p889_p1 = pnand %p887_p7, %p1168_p2  ;;  %p892_p0 = scmp.lt.u32.totalorder %s1200_s26, %s1378_s2 }
  0x5c   : > { %p893_p11 = scmp.lt.u32.totalorder %s891_s30, %s886_s10  ;;  %p895_p6 = scmp.lt.u32.totalorder %s886_s10, %s1200_s26 }
  0x5d   : > { %p890_p3 = pneg %p889_p1 }
  0x5e   : > { %p894_p5 = por %p893_p11, %p892_p0 }
  0x60   : > { %p896_p8 = por %p895_p6, %p894_p5 }
  0x62   : > { %p897_p9 = pnand %p896_p8, %p890_p3 }
  0x64   : > { %900 = shalt.err (!%p897_p9)
}
  0x65   : > { %s901_s14 = scalar_lea.vmem %s1217_s1, 256  ;;  %s1040_s13 = smov [#allocation7]  }
  0x66   : > { %p902_p12 = scmp.ne.s32.totalorder %s1217_s1, %s901_s14  ;;  %s906_s6 = sshll.u32 %s1040_s13, 4  ;;  %s907_s6 = int_to_ptr.vmem [resolvable:$false] %s906_s6 }
  0x67   : > { %s908_s5 = scalar_lea.vmem %s907_s6, 512  ;;  %p909_p7 = scmp.lt.s32.totalorder %s1217_s1, %s907_s6 }
  0x68   : > { %p904_p4 = pnand %p902_p12, %p1168_p2  ;;  %p910_p1 = scmp.lt.s32.totalorder %s908_s5, %s901_s14 }
  0x6a   : > { %p905_p10 = pneg %p904_p4  ;;  %p911_p0 = por %p910_p1, %p909_p7 }
  0x6c   : > { %p912_p11 = pnand %p911_p0, %p905_p10 }
  0x6e   : > { %915 = shalt.err (!%p912_p11)
}
  0x6f   : > { %s1405_s9 = smov 128   ;;  %p1406_p2 = scmp.ne.s32.totalorder %s1403_s23, 0 }
  0x70   : > { %759 = dma.hbm_to_vmem [thread:$0]  (!%p1404_p13), %s1200_s26, 256, %s1217_s1, %s1162_s22, %s1405_s9, %s1405_s9, %s1038_s11  }
  0x71   : > { %256 = sbr.rel (%p1406_p2) target bundleno = 889 (0x379), region = 32  ;;  %s1265_s25 = sand.u32 (!%p1406_p2), 1, %s1018_s16  }
  0x72   : > { %s1268_s24 = sshll.u32 (!%p1406_p2), %s1265_s25, 3  ;;  %s259_s8 = scalar_lea.sflag (!%p1406_p2), [#allocation3], %s1265_s25 }
  0x73   : > { %s262_s10 = scalar_lea.vmem (!%p1406_p2), [#allocation2], %s1268_s24  ;;  %p1407_p3 = scmp.ne.s32.totalorder (!%p1406_p2), %s1394_s27, 0 }
  0x78   : > { %997 = dma.done.wait (%p1407_p3), %s259_s8, 128  }
  0x79   : > { %999 = vsyncadd (%p1407_p3), %s259_s8, 4294967168  ;;  %s267_s1 = sand.u32 1, %s1102_s21   ;;  %s697_s23 = sshll.u32 %s1265_s25, 4 }
  0x7a   : > { %s268_s22 = scalar_lea.sflag [#allocation6], %s267_s1  ;;  %s271_s11 = scalar_lea.vmem [#allocation5], %s697_s23 }
  0x7b   : > { %1001 = dma.done.wait (%p1407_p3), %s268_s22, 512  }
  0x7c   : > { %1003 = vsyncadd (%p1407_p3), %s268_s22, 4294966784  ;;  %v1041_v0 = vmov 0.0|0.0   ;;  %vm1042_vm0 = vmmov 0   ;;  %v1043_v1 = vmov 0.0   ;;  %vm325_vm1 = vcmask 261120   ;;  %v321_v2 = vld [vmem:[%s271_s11] sm:$0xff] }
  0x7d   : > { %733 = vmatprep.subr.bf16.mxu0 %v1041_v0  ;;  %723 = vmatprep.mubr.msk.f32.mxu0 %vm1042_vm0, %v1043_v1  ;;  %v322_v3 = vld [vmem:[%s271_s11 + $0x8] sm:$0xff]  ;;  %vm735_vm2 = vmpackc.low %vm325_vm1, %vm325_vm1  ;;  %vm406_vm3 = vcmask 130048   ;;  %s280_s21 = scalar_lea.vmem [#allocation7], %s697_s23  ;;  %s319_s27 = scalar_lea.vmem [#allocation9], %s1268_s24 }
  0x7e   : > { %737 = vmatprep.subr.bf16.mxu1 %v1041_v0  ;;  %730 = vmatprep.mubr.msk.f32.mxu1 %vm1042_vm0, %v1043_v1  ;;  %v734_v4 = vpack.c.bf16 %v322_v3, %v321_v2  ;;  %v320_v5 = vld [vmem:[%s262_s10] sm:$0xff]  ;;  %v323_v15 = vld [vmem:[%s280_s21] sm:$0xff]  ;;  %s707_s26 = sshll.u32 %s1026_s18, 7  ;;  %s527_s12 = sshll.u32 %s319_s27, 4  ;;  %s528_s12 = int_to_ptr.vmem [resolvable:$true] %s527_s12 }
  0x7f   : > { %v324_v16 = vld [vmem:[%s280_s21 + $0x8] sm:$0xff]  ;;  %s1300_s30 = scalar_lea.hbm %s1380_s4, %s707_s26  ;;  %s499_s29 = scalar_lea.sflag [#allocation10], %s1265_s25 }
  0x80   : > { %736 = vmatpush3.bf16.xpose.msk.msra.mxu0 %vm735_vm2, %v734_v4  ;;  %v738_v17 = vpack.c.bf16 %v324_v16, %v323_v15  ;;  %s916_s14 = scalar_lea.vmem %s528_s12, 128  ;;  %p1408_p5 = scmp.ne.s32.totalorder %s1395_s28, 0 }
  0x81   : > { %p917_p13 = scmp.ne.s32.totalorder %s528_s12, %s916_s14  ;;  %s1044_s13 = smov [#allocation9]  }
  0x82   : > { %739 = vmatpush3.bf16.msra.mxu1 %v738_v17  ;;  %s920_s6 = sshll.u32 %s1044_s13, 4  ;;  %s921_s6 = int_to_ptr.vmem [resolvable:$false] %s920_s6 }
  0x83   : > { %p918_p6 = pnand %p917_p13, %p1408_p5  ;;  %s922_s5 = scalar_lea.vmem %s921_s6, 256 }
  0x84   : > { %p923_p9 = scmp.lt.s32.totalorder %s528_s12, %s921_s6  ;;  %p924_p12 = scmp.lt.s32.totalorder %s922_s5, %s916_s14 }
  0x85   : > { %p919_p8 = pneg %p918_p6 }
  0x86   : > { %p925_p4 = por %p924_p12, %p923_p9 }
  0x87   : > { %724 = vmatmul.mubr.msk.f32.vlgmr.msra.gmra.mrb[0].mxu0 %vm325_vm1, %v320_v5 }
  0x88   : > { %p926_p10 = pnand %p925_p4, %p919_p8 }
 0x15a   : > { %v401_v6 = vpop.f32.mrb[0].mxu0 }
 0x15b   : > { %v405_v7 = vmul.f32 0.17677669, %v401_v6  ;;  %v725_v8 = vpop.f32.mrb[1].mxu0 }
 0x15d   : > { %v407_v9 = vsel %vm406_vm3, %v405_v7, -inf }
 0x15e   : > { %408 = vmax.xlane.f32.xlu0 %v407_v9 }
 0x1eb   : > { %v409_v10 = vpop.xlane.xlu0 %408 }
 0x1ec   : > { %v410_v11 = vsub.f32 %v405_v7, %v409_v10 }
 0x1ee   : > { %v411_v12 = vmul.f32 1.442695, %v410_v11 }
 0x1f0   : > { %822 = vpow2.f32 %v411_v12 }
 0x1fa   : > { %v823_v13 = vpop.eup %822 }
 0x1fb   : > { %v413_v14 = vsel %vm406_vm3, %v823_v13, 0.0 }
 0x1fc   : > { %414 = vadd.xlane.f32.xlu0 %v413_v14 }
 0x289   : > { %v415_v18 = vpop.xlane.xlu0 %414 }
 0x28a   : > { %824 = vrcp.f32 %v415_v18 }
 0x294   : > { %v825_v19 = vpop.eup %824 }
 0x295   : > { %v417_v20 = vmul.f32 %v825_v19, %v823_v13 }
 0x297   : > { %731 = vmatmul.mubr.msk.f32.vlgmr.msra.gmra.mrb[0].mxu1 %vm406_vm3, %v417_v20  ;;  %418 = vst.msk [vmem:[%s319_s27] sm:$0xff] %vm406_vm3, %v417_v20 }
 0x298   : > { %929 = shalt.err (!%p926_p10)
}
 0x299   : > { %s930_s9 = scalar_lea.hbm %s1300_s30, 128  ;;  %s934_s1 = scalar_lea.hbm %s1380_s4, 256 }
 0x29a   : > { %p931_p7 = scmp.ne.s32.totalorder %s1300_s30, %s930_s9  ;;  %p935_p11 = scmp.lt.u32.totalorder %s1300_s30, %s1380_s4 }
 0x29b   : > { %p936_p2 = scmp.lt.u32.totalorder %s934_s1, %s930_s9  ;;  %p938_p13 = scmp.lt.u32.totalorder %s930_s9, %s1300_s30 }
 0x29c   : > { %p932_p1 = pnand %p931_p7, %p1408_p5 }
 0x29d   : > { %p937_p3 = por %p936_p2, %p935_p11 }
 0x29e   : > { %p933_p0 = pneg %p932_p1 }
 0x29f   : > { %p939_p6 = por %p938_p13, %p937_p3 }
 0x2a1   : > { %p940_p8 = pnand %p939_p6, %p933_p0 }
 0x2a3   : > { %943 = shalt.err (!%p940_p8)
}
 0x2a4   : > { %747 = dma.vmem_to_hbm [thread:$0]  (%p1408_p5), %s528_s12, 128, %s1300_s30, %s499_s29  }
 0x2a5   : > { %s312_s11 = scalar_lea.vmem [#allocation8], %s1268_s24  ;;  %s1326_s17 = scalar_lea.hbm %s1379_s3, %s707_s26 }
 0x2a6   : > { %s513_s21 = sshll.u32 %s312_s11, 4  ;;  %s494_s14 = scalar_lea.sflag [#allocation4], %s1265_s25  ;;  %s1328_s21 = int_to_ptr.vmem [resolvable:$true] %s513_s21 }
 0x2a7   : > { %s944_s13 = scalar_lea.vmem %s1328_s21, 128  ;;  %s1045_s18 = smov [#allocation8]  }
 0x2a8   : > { %p945_p9 = scmp.ne.s32.totalorder %s1328_s21, %s944_s13  ;;  %s948_s24 = sshll.u32 %s1045_s18, 4  ;;  %s949_s24 = int_to_ptr.vmem [resolvable:$false] %s948_s24 }
 0x2a9   : > { %s950_s26 = scalar_lea.vmem %s949_s24, 256  ;;  %p951_p10 = scmp.lt.s32.totalorder %s1328_s21, %s949_s24 }
 0x2aa   : > { %p946_p12 = pnand %p945_p9, %p1408_p5  ;;  %p952_p7 = scmp.lt.s32.totalorder %s950_s26, %s944_s13 }
 0x2ac   : > { %p947_p4 = pneg %p946_p12  ;;  %p953_p1 = por %p952_p7, %p951_p10 }
 0x2ae   : > { %p954_p0 = pnand %p953_p1, %p947_p4 }
 0x36a   : > { %v488_v21 = vpop.f32.mrb[0].mxu1 }
 0x36b   : > { %492 = vst.msk [vmem:[%s312_s11] sm:$0xff] %vm325_vm1, %v488_v21  ;;  %v732_v22 = vpop.f32.mrb[1].mxu1 }
 0x36c   : > { %957 = shalt.err (!%p954_p0)
}
 0x36d   : > { %s958_s25 = scalar_lea.hbm %s1326_s17, 128  ;;  %s962_s29 = scalar_lea.hbm %s1379_s3, 256 }
 0x36e   : > { %p959_p11 = scmp.ne.s32.totalorder %s1326_s17, %s958_s25  ;;  %p963_p13 = scmp.lt.u32.totalorder %s1326_s17, %s1379_s3 }
 0x36f   : > { %p964_p6 = scmp.lt.u32.totalorder %s962_s29, %s958_s25  ;;  %p966_p9 = scmp.lt.u32.totalorder %s958_s25, %s1326_s17 }
 0x370   : > { %p960_p2 = pnand %p959_p11, %p1408_p5 }
 0x371   : > { %p965_p8 = por %p964_p6, %p963_p13 }
 0x372   : > { %p961_p3 = pneg %p960_p2 }
 0x373   : > { %p967_p12 = por %p966_p9, %p965_p8 }
 0x375   : > { %p968_p4 = pnand %p967_p12, %p961_p3 }
 0x377   : > { %971 = shalt.err (!%p968_p4)
}
 0x378   : > { %746 = dma.vmem_to_hbm [thread:$0]  (%p1408_p5), %s1328_s21, 128, %s1326_s17, %s494_s14  }
 0x379 PF: > { %s1409_s9 = sld [smem:[#allocation18_spill]]  ;;  %s539_s8 = sand.u32 1, %s1014_s15  }
 0x37a   : > { %p1411_p7 = scmp.ge.s32.totalorder %s1034_s20, 2  ;;  %s540_s10 = scalar_lea.sflag [#allocation4], %s539_s8 }
 0x37f   : > { %p1410_p10 = scmp.ne.s32.totalorder %s1409_s9, 0 }
 0x381   : > { %p761_p1 = pnand %p1411_p7, %p1410_p10 }
 0x383   : > { %1005 = dma.done.wait (!%p761_p1), %s540_s10, 128  }
 0x384   : > { %1007 = vsyncadd (!%p761_p1), %s540_s10, 4294967168  ;;  %s549_s1 = scalar_lea.sflag [#allocation10], %s539_s8 }
 0x385   : > { %1009 = dma.done.wait (!%p761_p1), %s549_s1, 128  }
 0x386   : > { %1011 = vsyncadd (!%p761_p1), %s549_s1, 4294967168  ;;  %s27_s20 = sadd.s32 1, %s1034_s20   ;;  %s1412_s28 = sld [smem:[#allocation15_spill]] }
 0x387   : > { %p24_p0 = scmp.ge.s32.totalorder %s27_s20, 4   ;;  %s1413_s17 = sld [smem:[#allocation17_spill]] }
 0x388   : > { %s1414_s23 = sld [smem:[#allocation16_spill]]  ;;  %s1415_s15 = smov %s1018_s16 }
 0x389   : > { %s1417_s18 = smov %s1030_s19  ;;  %26 = sbr.rel (!%p24_p0) target bundleno = 12 (0xc), region = 118 }
 0x38c   : > { %s1416_s16 = smov %s1412_s28 }
 0x38e   : > { %s1418_s19 = smov %s1414_s23 }
 0x390   :  { %554 = vsyncpa [#allocation3], 1 }
 0x391   :  { %556 = vsyncpa [#allocation3 + $0x1], 1 }
 0x392   :  { %557 = vsyncpa [#allocation6], 1 }
 0x393   :  { %559 = vsyncpa [#allocation6 + $0x1], 1 }
 0x394   :  { %560 = vsyncpa [#allocation4], 1 }
 0x395   :  { %562 = vsyncpa [#allocation4 + $0x1], 1 }
 0x396   :  { %563 = vsyncpa [#allocation10], 1 }
 0x397   :  { %565 = vsyncpa [#allocation10 + $0x1], 1 }

</bundles_post_ra>
